<compile_context>
chip_gen: v5e
topology: v5e:2x2
jax: 0.10.0
libtpu: 0.0.40
codegen_flags: <defaults>
</compile_context>

<pallas_src>
import functools

import jax
import jax.numpy as jnp
import numpy as np
from jax.experimental import pallas as pl
from jax.experimental.pallas import tpu as pltpu


def _round_up(x, m):
    return (x + m - 1) // m * m


def _pick_tile(total, max_tile):
    """Largest tile <= max_tile that divides `total` and is a multiple of 128
    (or `total` itself when it already fits / nothing divides)."""
    if total <= max_tile:
        return total
    t = (max_tile // 128) * 128
    while t >= 128:
        if total % t == 0:
            return t
        t -= 128
    return total


def _pick_bt(n, h):
    """Batch tile for the fused conv kernel: lane-aligned stacked width and,
    when possible, >= 2 grid blocks so both v7x TensorCores get work."""
    for bt in (32, 16, 8, 4, 2, 1):
        if bt <= n and n % bt == 0 and (bt * h) % 128 == 0 and n // bt >= 2:
            return bt
    return n


def _tpu_config():
    try:
        cap = pltpu.get_tpu_info().vmem_capacity_bytes
    except Exception:
        cap = 64 * 1024 * 1024
    if cap <= 80 * 1024 * 1024:
        # v7x-class: 64 MiB VMEM per TC, 2 TensorCores -> keep a 2-block N axis
        # for the FC layers and leave VMEM headroom for Mosaic scratch.
        return {"tn_max": 256, "vmem_limit": 48 * 1024 * 1024}
    # v5e / v6e: single TensorCore, 128 MiB VMEM -> full-width (512) N tiles so
    # each FC weight streams as one uninterrupted pass.
    return {"tn_max": 512, "vmem_limit": 64 * 1024 * 1024}


_CFG = _tpu_config()
_TM_MAX = 256
_TK_MAX = 4096


# ---------------------------------------------------------------------------
# Kernel 1: fused conv1+relu -> conv2+relu -> conv3+relu.
#
# Activations are width-folded AND transposed AND batch-stacked along lanes:
#   AT[j*C + c, b*H + r] = act[b, c, r, j]
# so a 2x2 VALID conv is   out = sum_{kh in {0,1}}  M[kh] @ shift_kh(AT)
# with M built once at prep time.  The row shift by 1 is a single lane shift of
# the whole stacked block; rows that mix two samples only ever produce values
# that the zero-padded FC1 weight ignores (and they stay finite).
# ---------------------------------------------------------------------------
def _fused_conv_kernel(x_ref, m1_ref, b1_ref, m2_ref, b2_ref, m3_ref, b3_ref,
                       o_ref):
    bt, c, h = o_ref.shape

    def shift1(a):
        # a[:, i] <- a[:, i+1]; last (don't-care) column zero-filled.
        return jnp.pad(a[:, 1:], ((0, 0), (0, 1)))

    def conv(a, m_ref, b_ref):
        acc = jnp.dot(m_ref[0], a, preferred_element_type=jnp.float32)
        acc = acc + jnp.dot(m_ref[1], shift1(a),
                            preferred_element_type=jnp.float32)
        # single f32 bias add + ReLU, one cast to bf16 per layer
        return jnp.maximum(acc + b_ref[...], 0.0).astype(jnp.bfloat16)

    a = conv(x_ref[...], m1_ref, b1_ref)   # (3C, BT*H)
    a = conv(a, m2_ref, b2_ref)            # (2C, BT*H)
    a = conv(a, m3_ref, b3_ref)            # ( C, BT*H)
    for b in range(bt):                    # BT is static -> unrolled lane-dense stores
        o_ref[b] = a[:, b * h:(b + 1) * h]


def fused_conv3(xs, q, n, h):
    """xs: (4, N*H) bf16 transposed/width-folded input.  -> (N, C, H) bf16."""
    c = q["b3c"].shape[0]
    bt = _pick_bt(n, h)
    return pl.pallas_call(
        _fused_conv_kernel,
        out_shape=jax.ShapeDtypeStruct((n, c, h), jnp.bfloat16),
        grid_spec=pltpu.PrefetchScalarGridSpec(
            num_scalar_prefetch=0,
            grid=(n // bt,),
            in_specs=[
                pl.BlockSpec((4, bt * h), lambda i: (0, i)),
                pl.BlockSpec(q["m1"].shape, lambda i: (0, 0, 0)),
                pl.BlockSpec(q["b1c"].shape, lambda i: (0, 0)),
                pl.BlockSpec(q["m2"].shape, lambda i: (0, 0, 0)),
                pl.BlockSpec(q["b2c"].shape, lambda i: (0, 0)),
                pl.BlockSpec(q["m3"].shape, lambda i: (0, 0, 0)),
                pl.BlockSpec(q["b3c"].shape, lambda i: (0, 0)),
            ],
            out_specs=pl.BlockSpec((bt, c, h), lambda i: (i, 0, 0)),
        ),
        compiler_params=pltpu.CompilerParams(
            dimension_semantics=("parallel",),
            vmem_limit_bytes=_CFG["vmem_limit"]),
    )(xs, q["m1"], q["b1c"], q["m2"], q["b2c"], q["m3"], q["b3c"])


# ---------------------------------------------------------------------------
# Kernel 2: tiled matmul + bias + optional ReLU (FC1).  x gets a full-K block
# (fetched once per M block); the K tile is sliced in-kernel.  f32 accumulator
# over the K grid axis, bf16 output (feeds FC2).
# ---------------------------------------------------------------------------
def _fc_acc_kernel(x_ref, w_ref, b_ref, o_ref, acc_ref, *, tk, apply_relu):
    k = pl.program_id(2)

    @pl.when(k == 0)
    def _():
        acc_ref[...] = jnp.zeros_like(acc_ref)

    koff = pl.multiple_of(k * tk, tk)
    acc_ref[...] += jnp.dot(x_ref[:, pl.ds(koff, tk)], w_ref[...],
                            preferred_element_type=jnp.float32)

    @pl.when(k == pl.num_programs(2) - 1)
    def _():
        out = acc_ref[...] + b_ref[...]
        if apply_relu:
            out = jnp.maximum(out, 0.0)
        o_ref[...] = out.astype(o_ref.dtype)


def fc_layer(x, wp, bp, *, apply_relu, out_dtype):
    """relu?(x @ wp + bp) with wp/bp already transposed/padded/cast in prep."""
    m, kp = x.shape
    _, np_ = wp.shape
    tm = min(_TM_MAX, _round_up(m, 16))
    mp = _round_up(m, tm)
    if mp > m:
        x = jnp.pad(x, ((0, mp - m), (0, 0)))
    tk = _pick_tile(kp, _TK_MAX)
    tn = _pick_tile(np_, _CFG["tn_max"])
    grid = (mp // tm, np_ // tn, kp // tk)

    cost = pl.CostEstimate(
        flops=2 * mp * kp * np_,
        transcendentals=0,
        bytes_accessed=2 * (mp * kp + kp * np_ + mp * np_) + 4 * np_)

    return pl.pallas_call(
        functools.partial(_fc_acc_kernel, tk=tk, apply_relu=apply_relu),
        out_shape=jax.ShapeDtypeStruct((mp, np_), out_dtype),
        grid_spec=pltpu.PrefetchScalarGridSpec(
            num_scalar_prefetch=0,
            grid=grid,
            in_specs=[
                # full-K activation block: DMA'd once per M block, not per (M,N)
                pl.BlockSpec((tm, kp), lambda i, j, kk: (i, 0)),
                pl.BlockSpec((tk, tn), lambda i, j, kk: (kk, j)),
                pl.BlockSpec((1, tn), lambda i, j, kk: (0, j)),
            ],
            out_specs=pl.BlockSpec((tm, tn), lambda i, j, kk: (i, j)),
            scratch_shapes=[pltpu.VMEM((tm, tn), jnp.float32)],
        ),
        compiler_params=pltpu.CompilerParams(
            dimension_semantics=("parallel", "parallel", "arbitrary"),
            vmem_limit_bytes=_CFG["vmem_limit"]),
        cost_estimate=cost,
    )(x, wp, bp)


# ---------------------------------------------------------------------------
# Kernel 3: fused FC2(+bias+ReLU) -> FC3(+bias).  Both weights are tiny and
# fully resident; one launch, no HBM round trip of the hidden activation.
# ---------------------------------------------------------------------------
def _fc23_kernel(x_ref, w2_ref, b2_ref, w3_ref, b3_ref, o_ref):
    h = jnp.dot(x_ref[...], w2_ref[...], preferred_element_type=jnp.float32)
    h = jnp.maximum(h + b2_ref[...], 0.0).astype(jnp.bfloat16)
    o = jnp.dot(h, w3_ref[...], preferred_element_type=jnp.float32)
    o_ref[...] = (o + b3_ref[...]).astype(o_ref.dtype)


def fc2_fc3(x, q):
    m, k2 = x.shape
    n2 = q["fw2"].shape[1]
    n3 = q["fw3"].shape[1]
    tm = min(128, _round_up(m, 16))
    mp = _round_up(m, tm)
    if mp > m:
        x = jnp.pad(x, ((0, mp - m), (0, 0)))
    return pl.pallas_call(
        _fc23_kernel,
        out_shape=jax.ShapeDtypeStruct((mp, n3), jnp.float32),
        grid_spec=pltpu.PrefetchScalarGridSpec(
            num_scalar_prefetch=0,
            grid=(mp // tm,),
            in_specs=[
                pl.BlockSpec((tm, k2), lambda i: (i, 0)),
                pl.BlockSpec((k2, n2), lambda i: (0, 0)),
                pl.BlockSpec((1, n2), lambda i: (0, 0)),
                pl.BlockSpec((n2, n3), lambda i: (0, 0)),
                pl.BlockSpec((1, n3), lambda i: (0, 0)),
            ],
            out_specs=pl.BlockSpec((tm, n3), lambda i: (i, 0)),
        ),
        compiler_params=pltpu.CompilerParams(
            dimension_semantics=("parallel",),
            vmem_limit_bytes=_CFG["vmem_limit"]),
    )(x, q["fw2"], q["fb2"], q["fw3"], q["fb3"])


# ---------------------------------------------------------------------------
# One-time parameter preparation: every transpose / fold / pad / cast happens
# here, never per forward pass.
# ---------------------------------------------------------------------------
def _conv_w_prep_T(w_oihw, w_in):
    """Transposed width-folded 2x2 conv weight.

    Returns M: (2, w_out*Cout, w_in*Cin) with
      M[kh, j_out*Cout+co, j_in*Cin+ci] = w[co, ci, kh, j_in-j_out]   (j_in-j_out in {0,1})
    so that  conv_out_T = sum_kh  M[kh] @ shift_kh(AT)  on stacked activations.
    """
    w = np.asarray(w_oihw, np.float32)
    cout, cin, _, _ = w.shape
    w_out = w_in - 1
    m = np.zeros((2, w_out * cout, w_in * cin), np.float32)
    for kh in range(2):
        for kw in range(2):
            blk = w[:, :, kh, kw]                       # (cout, cin)
            for j_out in range(w_out):
                j_in = j_out + kw
                m[kh, j_out * cout:(j_out + 1) * cout,
                  j_in * cin:(j_in + 1) * cin] = blk
    return jnp.asarray(m, jnp.bfloat16)


def _conv_b_prep(b, w_out):
    col = np.tile(np.asarray(b, np.float32), w_out).reshape(-1, 1)
    return jnp.asarray(col, jnp.float32)


def prepare_params(p, nb_freq, phase_map):
    h, c = nb_freq, phase_map
    h3 = h - 3
    q = {}
    q["m1"] = _conv_w_prep_T(p["cw1"], 4)
    q["b1c"] = _conv_b_prep(p["cb1"], 3)
    q["m2"] = _conv_w_prep_T(p["cw2"], 3)
    q["b2c"] = _conv_b_prep(p["cb2"], 2)
    q["m3"] = _conv_w_prep_T(p["cw3"], 2)
    q["b3c"] = _conv_b_prep(p["cb3"], 1)

    # FC1: the conv kernel emits each sample as a (C, H) bf16 slab whose free
    # row-major flatten has K index c*H + hh (columns hh >= H-3 are junk).
    # PyTorch's .view flattens NCHW as c*H3 + hh, so re-index fw1's columns and
    # insert zero rows for the junk columns, once, here.
    nh = p["fw1"].shape[0]
    fw1 = np.asarray(p["fw1"], np.float32).reshape(nh, c, h3)
    fw1 = np.pad(fw1, ((0, 0), (0, 0), (0, h - h3))).reshape(nh, c * h)
    np1 = _round_up(nh, 128)
    q["fw1"] = jnp.asarray(np.pad(fw1.T, ((0, 0), (0, np1 - nh))),
                           jnp.bfloat16)                       # (c*h, np1)
    q["fb1"] = jnp.asarray(
        np.pad(np.asarray(p["fb1"], np.float32), (0, np1 - nh))[None, :])

    def fc_prep(w, b, k_pad):
        wn = np.asarray(w, np.float32)
        n_out, k_in = wn.shape
        npad = _round_up(n_out, 128)
        wp = np.pad(wn.T, ((0, k_pad - k_in), (0, npad - n_out)))
        bp = np.pad(np.asarray(b, np.float32), (0, npad - n_out))[None, :]
        return jnp.asarray(wp, jnp.bfloat16), jnp.asarray(bp, jnp.float32)

    q["fw2"], q["fb2"] = fc_prep(p["fw2"], p["fb2"], np1)
    q["fw3"], q["fb3"] = fc_prep(p["fw3"], p["fb3"], q["fw2"].shape[1])
    return q


# ---------------------------------------------------------------------------
# SimpleModel.forward
# ---------------------------------------------------------------------------
@functools.partial(jax.jit, static_argnames=("n_out",))
def simple_model_forward(x, q, n_out):
    """x: (N, 1, H, 4) float32 (NCHW, single input channel)."""
    n, _, h, w = x.shape
    # Stack the (tiny) input in transposed, width-folded form:
    # xs[j, b*H + r] = x[b, 0, r, j].
    xs = jnp.transpose(x[:, 0], (2, 0, 1)).reshape(w, n * h).astype(jnp.bfloat16)
    a = fused_conv3(xs, q, n, h)                    # (N, C, H) bf16
    # TODO(synk): nn.Dropout(p=0.02) is identity at inference; training-mode RNG dropout not implemented.
    a = a.reshape(n, -1)                            # free contiguous reshape -> pre-padded FC1 input
    a = fc_layer(a, q["fw1"], q["fb1"], apply_relu=True, out_dtype=jnp.bfloat16)
    a = fc2_fc3(a, q)                               # fused FC2(+relu) + FC3
    return a[:n, :n_out]


# ---------------------------------------------------------------------------
# Deterministic parameter init (PyTorch-style uniform(-1/sqrt(fan_in), ...)).
# ---------------------------------------------------------------------------
def init_params(key, nb_freq, phase_map, nb_hidden, n_out=37):
    ks = jax.random.split(key, 12)

    def u(k, shape, fan_in):
        bound = 1.0 / np.sqrt(fan_in)
        return jax.random.uniform(k, shape, jnp.float32, -bound, bound)

    p = {}
    p["cw1"] = u(ks[0], (phase_map, 1, 2, 2), 1 * 4)
    p["cb1"] = u(ks[1], (phase_map,), 1 * 4)
    p["cw2"] = u(ks[2], (phase_map, phase_map, 2, 2), phase_map * 4)
    p["cb2"] = u(ks[3], (phase_map,), phase_map * 4)
    p["cw3"] = u(ks[4], (phase_map, phase_map, 2, 2), phase_map * 4)
    p["cb3"] = u(ks[5], (phase_map,), phase_map * 4)
    fc_in = (nb_freq - 3) * phase_map
    p["fw1"] = u(ks[6], (nb_hidden, fc_in), fc_in)
    p["fb1"] = u(ks[7], (nb_hidden,), fc_in)
    p["fw2"] = u(ks[8], (nb_hidden, nb_hidden), nb_hidden)
    p["fb2"] = u(ks[9], (nb_hidden,), nb_hidden)
    p["fw3"] = u(ks[10], (n_out, nb_hidden), nb_hidden)
    p["fb3"] = u(ks[11], (n_out,), nb_hidden)
    return p


# ---------------------------------------------------------------------------
# Pure-JAX reference (correctness check, f32 end-to-end on raw params).
# ---------------------------------------------------------------------------
def reference_forward(x, p):
    def conv(x, w, b):
        y = jax.lax.conv_general_dilated(
            x, w, window_strides=(1, 1), padding="VALID",
            dimension_numbers=("NCHW", "OIHW", "NCHW"))
        return jax.nn.relu(y + b[None, :, None, None])

    x = conv(x, p["cw1"], p["cb1"])
    x = conv(x, p["cw2"], p["cb2"])
    x = conv(x, p["cw3"], p["cb3"])
    x = x.reshape(x.shape[0], -1)
    x = jax.nn.relu(x @ p["fw1"].T + p["fb1"])
    x = jax.nn.relu(x @ p["fw2"].T + p["fb2"])
    return x @ p["fw3"].T + p["fb3"]


if __name__ == "__main__":
    # Small shapes consistent with the module structure
    # (full model: nb_freq=256, phase_map=64, nb_hidden=512, input (N,1,256,4)).
    nb_freq, phase_map, nb_hidden, batch = 32, 16, 64, 8

    key = jax.random.PRNGKey(0)
    k_x, k_p = jax.random.split(key)
    x = jax.random.normal(k_x, (batch, 1, nb_freq, 4), jnp.float32)
    params = init_params(k_p, nb_freq, phase_map, nb_hidden)
    kparams = prepare_params(params, nb_freq, phase_map)    # one-time weight prep
    n_out = params["fw3"].shape[0]

    out = jax.block_until_ready(simple_model_forward(x, kparams, n_out=n_out))
    ref = jax.block_until_ready(reference_forward(x, params))

    assert out.shape == (batch, n_out), out.shape
    # bf16 matmul inputs (f32 accumulation) -> loosened tolerance vs f32 reference.
    np.testing.assert_allclose(np.asarray(out), np.asarray(ref),
                               rtol=3e-2, atol=3e-2)
    print("KERNEL_OK")
</pallas_src>

<mosaic_0001>
module attributes {stable_mosaic.version = 11 : i64} {
  func.func @_fc_acc_kernel(%arg0: i32, %arg1: i32, %arg2: i32, %arg3: memref<16x512xbf16, #tpu.memory_space<vmem>>, %arg4: memref<512x128xbf16, #tpu.memory_space<vmem>>, %arg5: memref<1x128xf32, #tpu.memory_space<vmem>>, %arg6: memref<16x128xbf16, #tpu.memory_space<vmem>>, %arg7: memref<16x128xf32, #tpu.memory_space<vmem>>) attributes {dimension_semantics = [#tpu.dimension_semantics<parallel>, #tpu.dimension_semantics<parallel>, #tpu.dimension_semantics<arbitrary>], iteration_bounds = array<i64: 1, 1, 1>, scalar_prefetch = 0 : i64, scratch_operands = 1 : i64, tpu.core_type = #tpu.core_type<tc>, window_params = [{transform_indices = @transform_0, window_bounds = array<i64: 16, 512>}, {transform_indices = @transform_1, window_bounds = array<i64: 512, 128>}, {transform_indices = @transform_2, window_bounds = array<i64: 1, 128>}, {transform_indices = @transform_3, window_bounds = array<i64: 16, 128>}]} {
    %c0_i32 = arith.constant 0 : i32
    %0 = arith.cmpi eq, %arg2, %c0_i32 : i32
    %1 = arith.extui %0 : i1 to i32
    %c0_i32_0 = arith.constant 0 : i32
    %2 = arith.cmpi ne, %1, %c0_i32_0 : i32
    scf.if %2 {
      %cst_9 = arith.constant 0.000000e+00 : f32
      %15 = vector.broadcast %cst_9 : f32 to vector<16x128xf32>
      %c0_10 = arith.constant 0 : index
      %c0_11 = arith.constant 0 : index
      %16 = vector.load %arg7[%c0_10, %c0_11] : memref<16x128xf32, #tpu.memory_space<vmem>>, vector<16x128xf32>
      tpu.vector_store %arg7[%c0_10, %c0_11], %15 {strides = array<i32>} : memref<16x128xf32, #tpu.memory_space<vmem>>, vector<16x128xf32>,
    } else {
    }
    %c512_i32 = arith.constant 512 : i32
    %3 = arith.muli %arg2, %c512_i32 : i32
    %4 = tpu.assume_multiple %3, 512 : i32
    %c0 = arith.constant 0 : index
    %c0_1 = arith.constant 0 : index
    %5 = vector.load %arg7[%c0, %c0_1] : memref<16x128xf32, #tpu.memory_space<vmem>>, vector<16x128xf32>
    %c0_2 = arith.constant 0 : index
    %6 = arith.index_cast %4 : i32 to index
    %7 = vector.load %arg3[%c0_2, %6] : memref<16x512xbf16, #tpu.memory_space<vmem>>, vector<16x512xbf16>
    %c0_3 = arith.constant 0 : index
    %c0_4 = arith.constant 0 : index
    %8 = vector.load %arg4[%c0_3, %c0_4] : memref<512x128xbf16, #tpu.memory_space<vmem>>, vector<512x128xbf16>
    %cst = arith.constant dense<0.000000e+00> : vector<16x128xf32>
    %9 = tpu.matmul %7, %8, %cst {dimension_numbers = #tpu.dot_dimension_numbers<[1], [0], [0], [1], [0, 0, 1, 1], [], []>} : vector<16x512xbf16>, vector<512x128xbf16>, vector<16x128xf32> -> vector<16x128xf32>
    %10 = arith.addf %5, %9 : vector<16x128xf32>
    %c0_5 = arith.constant 0 : index
    %c0_6 = arith.constant 0 : index
    %11 = vector.load %arg7[%c0_5, %c0_6] : memref<16x128xf32, #tpu.memory_space<vmem>>, vector<16x128xf32>
    tpu.vector_store %arg7[%c0_5, %c0_6], %10 {strides = array<i32>} : memref<16x128xf32, #tpu.memory_space<vmem>>, vector<16x128xf32>,
    %c0_i32_7 = arith.constant 0 : i32
    %12 = arith.cmpi eq, %arg2, %c0_i32_7 : i32
    %13 = arith.extui %12 : i1 to i32
    %c0_i32_8 = arith.constant 0 : i32
    %14 = arith.cmpi ne, %13, %c0_i32_8 : i32
    scf.if %14 {
      %c0_9 = arith.constant 0 : index
      %c0_10 = arith.constant 0 : index
      %15 = vector.load %arg7[%c0_9, %c0_10] : memref<16x128xf32, #tpu.memory_space<vmem>>, vector<16x128xf32>
      %c0_11 = arith.constant 0 : index
      %c0_12 = arith.constant 0 : index
      %16 = vector.load %arg5[%c0_11, %c0_12] : memref<1x128xf32, #tpu.memory_space<vmem>>, vector<1x128xf32>
      %17 = vector.broadcast %16 : vector<1x128xf32> to vector<16x128xf32>
      %18 = arith.addf %15, %17 : vector<16x128xf32>
      %cst_13 = arith.constant 0.000000e+00 : f32
      %19 = vector.broadcast %cst_13 : f32 to vector<16x128xf32>
      %20 = arith.maximumf %18, %19 : vector<16x128xf32>
      %21 = arith.truncf %20 : vector<16x128xf32> to vector<16x128xbf16>
      %c0_14 = arith.constant 0 : index
      %c0_15 = arith.constant 0 : index
      %22 = vector.load %arg6[%c0_14, %c0_15] : memref<16x128xbf16, #tpu.memory_space<vmem>>, vector<16x128xbf16>
      tpu.vector_store %arg6[%c0_14, %c0_15], %21 {strides = array<i32>} : memref<16x128xbf16, #tpu.memory_space<vmem>>, vector<16x128xbf16>,
    } else {
    }
    return
  }
  func.func @transform_0(%arg0: i32, %arg1: i32, %arg2: i32) -> (i32, i32) {
    %c0_i32 = arith.constant 0 : i32
    %c0_i32_0 = arith.constant 0 : i32
    return %arg0, %c0_i32 : i32, i32
  }
  func.func @transform_1(%arg0: i32, %arg1: i32, %arg2: i32) -> (i32, i32) {
    %c0_i32 = arith.constant 0 : i32
    return %arg2, %arg1 : i32, i32
  }
  func.func @transform_2(%arg0: i32, %arg1: i32, %arg2: i32) -> (i32, i32) {
    %c0_i32 = arith.constant 0 : i32
    %c0_i32_0 = arith.constant 0 : i32
    return %c0_i32, %arg1 : i32, i32
  }
  func.func @transform_3(%arg0: i32, %arg1: i32, %arg2: i32) -> (i32, i32) {
    %c0_i32 = arith.constant 0 : i32
    return %arg0, %arg1 : i32, i32
  }
}

module attributes {stable_mosaic.version = 11 : i64} {
  func.func @_fused_conv_kernel(%arg0: i32, %arg1: memref<4x128xbf16, #tpu.memory_space<vmem>>, %arg2: memref<2x48x4xbf16, #tpu.memory_space<vmem>>, %arg3: memref<48x1xf32, #tpu.memory_space<vmem>>, %arg4: memref<2x32x48xbf16, #tpu.memory_space<vmem>>, %arg5: memref<32x1xf32, #tpu.memory_space<vmem>>, %arg6: memref<2x16x32xbf16, #tpu.memory_space<vmem>>, %arg7: memref<16x1xf32, #tpu.memory_space<vmem>>, %arg8: memref<4x16x32xbf16, #tpu.memory_space<vmem>>) attributes {dimension_semantics = [#tpu.dimension_semantics<parallel>], iteration_bounds = array<i64: 2>, scalar_prefetch = 0 : i64, scratch_operands = 0 : i64, tpu.core_type = #tpu.core_type<tc>, window_params = [{transform_indices = @transform_0, window_bounds = array<i64: 4, 128>}, {pipeline_mode = #tpu.pipeline_mode<synchronous>, transform_indices = @transform_1, window_bounds = array<i64: 2, 48, 4>}, {pipeline_mode = #tpu.pipeline_mode<synchronous>, transform_indices = @transform_2, window_bounds = array<i64: 48, 1>}, {pipeline_mode = #tpu.pipeline_mode<synchronous>, transform_indices = @transform_3, window_bounds = array<i64: 2, 32, 48>}, {pipeline_mode = #tpu.pipeline_mode<synchronous>, transform_indices = @transform_4, window_bounds = array<i64: 32, 1>}, {pipeline_mode = #tpu.pipeline_mode<synchronous>, transform_indices = @transform_5, window_bounds = array<i64: 2, 16, 32>}, {pipeline_mode = #tpu.pipeline_mode<synchronous>, transform_indices = @transform_6, window_bounds = array<i64: 16, 1>}, {transform_indices = @transform_7, window_bounds = array<i64: 4, 16, 32>}]} {
    %c0 = arith.constant 0 : index
    %c0_0 = arith.constant 0 : index
    %0 = vector.load %arg1[%c0, %c0_0] : memref<4x128xbf16, #tpu.memory_space<vmem>>, vector<4x128xbf16>
    %c0_1 = arith.constant 0 : index
    %c0_2 = arith.constant 0 : index
    %c0_3 = arith.constant 0 : index
    %1 = vector.load %arg2[%c0_1, %c0_2, %c0_3] : memref<2x48x4xbf16, #tpu.memory_space<vmem>>, vector<1x48x4xbf16>
    %2 = vector.shape_cast %1 : vector<1x48x4xbf16> to vector<48x4xbf16>
    %cst = arith.constant dense<0.000000e+00> : vector<48x128xf32>
    %3 = tpu.matmul %2, %0, %cst {dimension_numbers = #tpu.dot_dimension_numbers<[1], [0], [0], [1], [0, 0, 1, 1], [], []>} : vector<48x4xbf16>, vector<4x128xbf16>, vector<48x128xf32> -> vector<48x128xf32>
    %c1 = arith.constant 1 : index
    %c0_4 = arith.constant 0 : index
    %c0_5 = arith.constant 0 : index
    %4 = vector.load %arg2[%c1, %c0_4, %c0_5] : memref<2x48x4xbf16, #tpu.memory_space<vmem>>, vector<1x48x4xbf16>
    %5 = vector.shape_cast %4 : vector<1x48x4xbf16> to vector<48x4xbf16>
    %6 = vector.extract_strided_slice %0 {offsets = [0, 1], sizes = [4, 127], strides = [1, 1]} : vector<4x128xbf16> to vector<4x127xbf16>
    %c0_i32 = arith.constant 0 : i32
    %7 = arith.sitofp %c0_i32 : i32 to bf16
    %8 = vector.broadcast %7 : bf16 to vector<4x1xbf16>
    %9 = tpu.concatenate %6, %8 in 1 : vector<4x127xbf16>, vector<4x1xbf16> -> vector<4x128xbf16>
    %cst_6 = arith.constant dense<0.000000e+00> : vector<48x128xf32>
    %10 = tpu.matmul %5, %9, %cst_6 {dimension_numbers = #tpu.dot_dimension_numbers<[1], [0], [0], [1], [0, 0, 1, 1], [], []>} : vector<48x4xbf16>, vector<4x128xbf16>, vector<48x128xf32> -> vector<48x128xf32>
    %11 = arith.addf %3, %10 : vector<48x128xf32>
    %c0_7 = arith.constant 0 : index
    %c0_8 = arith.constant 0 : index
    %12 = vector.load %arg3[%c0_7, %c0_8] : memref<48x1xf32, #tpu.memory_space<vmem>>, vector<48x1xf32>
    %13 = vector.broadcast %12 : vector<48x1xf32> to vector<48x128xf32>
    %14 = arith.addf %11, %13 : vector<48x128xf32>
    %cst_9 = arith.constant 0.000000e+00 : f32
    %15 = vector.broadcast %cst_9 : f32 to vector<48x128xf32>
    %16 = arith.maximumf %14, %15 : vector<48x128xf32>
    %17 = arith.truncf %16 : vector<48x128xf32> to vector<48x128xbf16>
    %c0_10 = arith.constant 0 : index
    %c0_11 = arith.constant 0 : index
    %c0_12 = arith.constant 0 : index
    %18 = vector.load %arg4[%c0_10, %c0_11, %c0_12] : memref<2x32x48xbf16, #tpu.memory_space<vmem>>, vector<1x32x48xbf16>
    %19 = vector.shape_cast %18 : vector<1x32x48xbf16> to vector<32x48xbf16>
    %cst_13 = arith.constant dense<0.000000e+00> : vector<32x128xf32>
    %20 = tpu.matmul %19, %17, %cst_13 {dimension_numbers = #tpu.dot_dimension_numbers<[1], [0], [0], [1], [0, 0, 1, 1], [], []>} : vector<32x48xbf16>, vector<48x128xbf16>, vector<32x128xf32> -> vector<32x128xf32>
    %c1_14 = arith.constant 1 : index
    %c0_15 = arith.constant 0 : index
    %c0_16 = arith.constant 0 : index
    %21 = vector.load %arg4[%c1_14, %c0_15, %c0_16] : memref<2x32x48xbf16, #tpu.memory_space<vmem>>, vector<1x32x48xbf16>
    %22 = vector.shape_cast %21 : vector<1x32x48xbf16> to vector<32x48xbf16>
    %23 = vector.extract_strided_slice %17 {offsets = [0, 1], sizes = [48, 127], strides = [1, 1]} : vector<48x128xbf16> to vector<48x127xbf16>
    %c0_i32_17 = arith.constant 0 : i32
    %24 = arith.sitofp %c0_i32_17 : i32 to bf16
    %25 = vector.broadcast %24 : bf16 to vector<48x1xbf16>
    %26 = tpu.concatenate %23, %25 in 1 : vector<48x127xbf16>, vector<48x1xbf16> -> vector<48x128xbf16>
    %cst_18 = arith.constant dense<0.000000e+00> : vector<32x128xf32>
    %27 = tpu.matmul %22, %26, %cst_18 {dimension_numbers = #tpu.dot_dimension_numbers<[1], [0], [0], [1], [0, 0, 1, 1], [], []>} : vector<32x48xbf16>, vector<48x128xbf16>, vector<32x128xf32> -> vector<32x128xf32>
    %28 = arith.addf %20, %27 : vector<32x128xf32>
    %c0_19 = arith.constant 0 : index
    %c0_20 = arith.constant 0 : index
    %29 = vector.load %arg5[%c0_19, %c0_20] : memref<32x1xf32, #tpu.memory_space<vmem>>, vector<32x1xf32>
    %30 = vector.broadcast %29 : vector<32x1xf32> to vector<32x128xf32>
    %31 = arith.addf %28, %30 : vector<32x128xf32>
    %cst_21 = arith.constant 0.000000e+00 : f32
    %32 = vector.broadcast %cst_21 : f32 to vector<32x128xf32>
    %33 = arith.maximumf %31, %32 : vector<32x128xf32>
    %34 = arith.truncf %33 : vector<32x128xf32> to vector<32x128xbf16>
    %c0_22 = arith.constant 0 : index
    %c0_23 = arith.constant 0 : index
    %c0_24 = arith.constant 0 : index
    %35 = vector.load %arg6[%c0_22, %c0_23, %c0_24] : memref<2x16x32xbf16, #tpu.memory_space<vmem>>, vector<1x16x32xbf16>
    %36 = vector.shape_cast %35 : vector<1x16x32xbf16> to vector<16x32xbf16>
    %cst_25 = arith.constant dense<0.000000e+00> : vector<16x128xf32>
    %37 = tpu.matmul %36, %34, %cst_25 {dimension_numbers = #tpu.dot_dimension_numbers<[1], [0], [0], [1], [0, 0, 1, 1], [], []>} : vector<16x32xbf16>, vector<32x128xbf16>, vector<16x128xf32> -> vector<16x128xf32>
    %c1_26 = arith.constant 1 : index
    %c0_27 = arith.constant 0 : index
    %c0_28 = arith.constant 0 : index
    %38 = vector.load %arg6[%c1_26, %c0_27, %c0_28] : memref<2x16x32xbf16, #tpu.memory_space<vmem>>, vector<1x16x32xbf16>
    %39 = vector.shape_cast %38 : vector<1x16x32xbf16> to vector<16x32xbf16>
    %40 = vector.extract_strided_slice %34 {offsets = [0, 1], sizes = [32, 127], strides = [1, 1]} : vector<32x128xbf16> to vector<32x127xbf16>
    %c0_i32_29 = arith.constant 0 : i32
    %41 = arith.sitofp %c0_i32_29 : i32 to bf16
    %42 = vector.broadcast %41 : bf16 to vector<32x1xbf16>
    %43 = tpu.concatenate %40, %42 in 1 : vector<32x127xbf16>, vector<32x1xbf16> -> vector<32x128xbf16>
    %cst_30 = arith.constant dense<0.000000e+00> : vector<16x128xf32>
    %44 = tpu.matmul %39, %43, %cst_30 {dimension_numbers = #tpu.dot_dimension_numbers<[1], [0], [0], [1], [0, 0, 1, 1], [], []>} : vector<16x32xbf16>, vector<32x128xbf16>, vector<16x128xf32> -> vector<16x128xf32>
    %45 = arith.addf %37, %44 : vector<16x128xf32>
    %c0_31 = arith.constant 0 : index
    %c0_32 = arith.constant 0 : index
    %46 = vector.load %arg7[%c0_31, %c0_32] : memref<16x1xf32, #tpu.memory_space<vmem>>, vector<16x1xf32>
    %47 = vector.broadcast %46 : vector<16x1xf32> to vector<16x128xf32>
    %48 = arith.addf %45, %47 : vector<16x128xf32>
    %cst_33 = arith.constant 0.000000e+00 : f32
    %49 = vector.broadcast %cst_33 : f32 to vector<16x128xf32>
    %50 = arith.maximumf %48, %49 : vector<16x128xf32>
    %51 = arith.truncf %50 : vector<16x128xf32> to vector<16x128xbf16>
    %52 = vector.extract_strided_slice %51 {offsets = [0, 0], sizes = [16, 32], strides = [1, 1]} : vector<16x128xbf16> to vector<16x32xbf16>
    %c0_34 = arith.constant 0 : index
    %c0_35 = arith.constant 0 : index
    %c0_36 = arith.constant 0 : index
    %53 = vector.load %arg8[%c0_34, %c0_35, %c0_36] : memref<4x16x32xbf16, #tpu.memory_space<vmem>>, vector<1x16x32xbf16>
    %54 = vector.shape_cast %53 : vector<1x16x32xbf16> to vector<16x32xbf16>
    %55 = vector.shape_cast %52 : vector<16x32xbf16> to vector<1x16x32xbf16>
    tpu.vector_store %arg8[%c0_34, %c0_35, %c0_36], %55 {strides = array<i32>} : memref<4x16x32xbf16, #tpu.memory_space<vmem>>, vector<1x16x32xbf16>,
    %56 = vector.extract_strided_slice %51 {offsets = [0, 32], sizes = [16, 32], strides = [1, 1]} : vector<16x128xbf16> to vector<16x32xbf16>
    %c1_37 = arith.constant 1 : index
    %c0_38 = arith.constant 0 : index
    %c0_39 = arith.constant 0 : index
    %57 = vector.load %arg8[%c1_37, %c0_38, %c0_39] : memref<4x16x32xbf16, #tpu.memory_space<vmem>>, vector<1x16x32xbf16>
    %58 = vector.shape_cast %57 : vector<1x16x32xbf16> to vector<16x32xbf16>
    %59 = vector.shape_cast %56 : vector<16x32xbf16> to vector<1x16x32xbf16>
    tpu.vector_store %arg8[%c1_37, %c0_38, %c0_39], %59 {strides = array<i32>} : memref<4x16x32xbf16, #tpu.memory_space<vmem>>, vector<1x16x32xbf16>,
    %60 = vector.extract_strided_slice %51 {offsets = [0, 64], sizes = [16, 32], strides = [1, 1]} : vector<16x128xbf16> to vector<16x32xbf16>
    %c2 = arith.constant 2 : index
    %c0_40 = arith.constant 0 : index
    %c0_41 = arith.constant 0 : index
    %61 = vector.load %arg8[%c2, %c0_40, %c0_41] : memref<4x16x32xbf16, #tpu.memory_space<vmem>>, vector<1x16x32xbf16>
    %62 = vector.shape_cast %61 : vector<1x16x32xbf16> to vector<16x32xbf16>
    %63 = vector.shape_cast %60 : vector<16x32xbf16> to vector<1x16x32xbf16>
    tpu.vector_store %arg8[%c2, %c0_40, %c0_41], %63 {strides = array<i32>} : memref<4x16x32xbf16, #tpu.memory_space<vmem>>, vector<1x16x32xbf16>,
    %64 = vector.extract_strided_slice %51 {offsets = [0, 96], sizes = [16, 32], strides = [1, 1]} : vector<16x128xbf16> to vector<16x32xbf16>
    %c3 = arith.constant 3 : index
    %c0_42 = arith.constant 0 : index
    %c0_43 = arith.constant 0 : index
    %65 = vector.load %arg8[%c3, %c0_42, %c0_43] : memref<4x16x32xbf16, #tpu.memory_space<vmem>>, vector<1x16x32xbf16>
    %66 = vector.shape_cast %65 : vector<1x16x32xbf16> to vector<16x32xbf16>
    %67 = vector.shape_cast %64 : vector<16x32xbf16> to vector<1x16x32xbf16>
    tpu.vector_store %arg8[%c3, %c0_42, %c0_43], %67 {strides = array<i32>} : memref<4x16x32xbf16, #tpu.memory_space<vmem>>, vector<1x16x32xbf16>,
    return
  }
  func.func @transform_0(%arg0: i32) -> (i32, i32) {
    %c0_i32 = arith.constant 0 : i32
    %c0_i32_0 = arith.constant 0 : i32
    return %c0_i32, %arg0 : i32, i32
  }
  func.func @transform_1(%arg0: i32) -> (i32, i32, i32) {
    %c0_i32 = arith.constant 0 : i32
    %c0_i32_0 = arith.constant 0 : i32
    %c0_i32_1 = arith.constant 0 : i32
    %c0_i32_2 = arith.constant 0 : i32
    return %c0_i32, %c0_i32_0, %c0_i32_1 : i32, i32, i32
  }
  func.func @transform_2(%arg0: i32) -> (i32, i32) {
    %c0_i32 = arith.constant 0 : i32
    %c0_i32_0 = arith.constant 0 : i32
    %c0_i32_1 = arith.constant 0 : i32
    return %c0_i32, %c0_i32_0 : i32, i32
  }
  func.func @transform_3(%arg0: i32) -> (i32, i32, i32) {
    %c0_i32 = arith.constant 0 : i32
    %c0_i32_0 = arith.constant 0 : i32
    %c0_i32_1 = arith.constant 0 : i32
    %c0_i32_2 = arith.constant 0 : i32
    return %c0_i32, %c0_i32_0, %c0_i32_1 : i32, i32, i32
  }
  func.func @transform_4(%arg0: i32) -> (i32, i32) {
    %c0_i32 = arith.constant 0 : i32
    %c0_i32_0 = arith.constant 0 : i32
    %c0_i32_1 = arith.constant 0 : i32
    return %c0_i32, %c0_i32_0 : i32, i32
  }
  func.func @transform_5(%arg0: i32) -> (i32, i32, i32) {
    %c0_i32 = arith.constant 0 : i32
    %c0_i32_0 = arith.constant 0 : i32
    %c0_i32_1 = arith.constant 0 : i32
    %c0_i32_2 = arith.constant 0 : i32
    return %c0_i32, %c0_i32_0, %c0_i32_1 : i32, i32, i32
  }
  func.func @transform_6(%arg0: i32) -> (i32, i32) {
    %c0_i32 = arith.constant 0 : i32
    %c0_i32_0 = arith.constant 0 : i32
    %c0_i32_1 = arith.constant 0 : i32
    return %c0_i32, %c0_i32_0 : i32, i32
  }
  func.func @transform_7(%arg0: i32) -> (i32, i32, i32) {
    %c0_i32 = arith.constant 0 : i32
    %c0_i32_0 = arith.constant 0 : i32
    %c0_i32_1 = arith.constant 0 : i32
    return %arg0, %c0_i32, %c0_i32_0 : i32, i32, i32
  }
}

module attributes {stable_mosaic.version = 11 : i64} {
  func.func @_fc23_kernel(%arg0: i32, %arg1: memref<16x128xbf16, #tpu.memory_space<vmem>>, %arg2: memref<128x128xbf16, #tpu.memory_space<vmem>>, %arg3: memref<1x128xf32, #tpu.memory_space<vmem>>, %arg4: memref<128x128xbf16, #tpu.memory_space<vmem>>, %arg5: memref<1x128xf32, #tpu.memory_space<vmem>>, %arg6: memref<16x128xf32, #tpu.memory_space<vmem>>) attributes {dimension_semantics = [#tpu.dimension_semantics<parallel>], iteration_bounds = array<i64: 1>, scalar_prefetch = 0 : i64, scratch_operands = 0 : i64, tpu.core_type = #tpu.core_type<tc>, window_params = [{transform_indices = @transform_0, window_bounds = array<i64: 16, 128>}, {pipeline_mode = #tpu.pipeline_mode<synchronous>, transform_indices = @transform_1, window_bounds = array<i64: 128, 128>}, {pipeline_mode = #tpu.pipeline_mode<synchronous>, transform_indices = @transform_2, window_bounds = array<i64: 1, 128>}, {pipeline_mode = #tpu.pipeline_mode<synchronous>, transform_indices = @transform_3, window_bounds = array<i64: 128, 128>}, {pipeline_mode = #tpu.pipeline_mode<synchronous>, transform_indices = @transform_4, window_bounds = array<i64: 1, 128>}, {transform_indices = @transform_5, window_bounds = array<i64: 16, 128>}]} {
    %c0 = arith.constant 0 : index
    %c0_0 = arith.constant 0 : index
    %0 = vector.load %arg1[%c0, %c0_0] : memref<16x128xbf16, #tpu.memory_space<vmem>>, vector<16x128xbf16>
    %c0_1 = arith.constant 0 : index
    %c0_2 = arith.constant 0 : index
    %1 = vector.load %arg2[%c0_1, %c0_2] : memref<128x128xbf16, #tpu.memory_space<vmem>>, vector<128x128xbf16>
    %cst = arith.constant dense<0.000000e+00> : vector<16x128xf32>
    %2 = tpu.matmul %0, %1, %cst {dimension_numbers = #tpu.dot_dimension_numbers<[1], [0], [0], [1], [0, 0, 1, 1], [], []>} : vector<16x128xbf16>, vector<128x128xbf16>, vector<16x128xf32> -> vector<16x128xf32>
    %c0_3 = arith.constant 0 : index
    %c0_4 = arith.constant 0 : index
    %3 = vector.load %arg3[%c0_3, %c0_4] : memref<1x128xf32, #tpu.memory_space<vmem>>, vector<1x128xf32>
    %4 = vector.broadcast %3 : vector<1x128xf32> to vector<16x128xf32>
    %5 = arith.addf %2, %4 : vector<16x128xf32>
    %cst_5 = arith.constant 0.000000e+00 : f32
    %6 = vector.broadcast %cst_5 : f32 to vector<16x128xf32>
    %7 = arith.maximumf %5, %6 : vector<16x128xf32>
    %8 = arith.truncf %7 : vector<16x128xf32> to vector<16x128xbf16>
    %c0_6 = arith.constant 0 : index
    %c0_7 = arith.constant 0 : index
    %9 = vector.load %arg4[%c0_6, %c0_7] : memref<128x128xbf16, #tpu.memory_space<vmem>>, vector<128x128xbf16>
    %cst_8 = arith.constant dense<0.000000e+00> : vector<16x128xf32>
    %10 = tpu.matmul %8, %9, %cst_8 {dimension_numbers = #tpu.dot_dimension_numbers<[1], [0], [0], [1], [0, 0, 1, 1], [], []>} : vector<16x128xbf16>, vector<128x128xbf16>, vector<16x128xf32> -> vector<16x128xf32>
    %c0_9 = arith.constant 0 : index
    %c0_10 = arith.constant 0 : index
    %11 = vector.load %arg5[%c0_9, %c0_10] : memref<1x128xf32, #tpu.memory_space<vmem>>, vector<1x128xf32>
    %12 = vector.broadcast %11 : vector<1x128xf32> to vector<16x128xf32>
    %13 = arith.addf %10, %12 : vector<16x128xf32>
    %c0_11 = arith.constant 0 : index
    %c0_12 = arith.constant 0 : index
    %14 = vector.load %arg6[%c0_11, %c0_12] : memref<16x128xf32, #tpu.memory_space<vmem>>, vector<16x128xf32>
    tpu.vector_store %arg6[%c0_11, %c0_12], %13 {strides = array<i32>} : memref<16x128xf32, #tpu.memory_space<vmem>>, vector<16x128xf32>,
    return
  }
  func.func @transform_0(%arg0: i32) -> (i32, i32) {
    %c0_i32 = arith.constant 0 : i32
    %c0_i32_0 = arith.constant 0 : i32
    return %arg0, %c0_i32 : i32, i32
  }
  func.func @transform_1(%arg0: i32) -> (i32, i32) {
    %c0_i32 = arith.constant 0 : i32
    %c0_i32_0 = arith.constant 0 : i32
    %c0_i32_1 = arith.constant 0 : i32
    return %c0_i32, %c0_i32_0 : i32, i32
  }
  func.func @transform_2(%arg0: i32) -> (i32, i32) {
    %c0_i32 = arith.constant 0 : i32
    %c0_i32_0 = arith.constant 0 : i32
    %c0_i32_1 = arith.constant 0 : i32
    return %c0_i32, %c0_i32_0 : i32, i32
  }
  func.func @transform_3(%arg0: i32) -> (i32, i32) {
    %c0_i32 = arith.constant 0 : i32
    %c0_i32_0 = arith.constant 0 : i32
    %c0_i32_1 = arith.constant 0 : i32
    return %c0_i32, %c0_i32_0 : i32, i32
  }
  func.func @transform_4(%arg0: i32) -> (i32, i32) {
    %c0_i32 = arith.constant 0 : i32
    %c0_i32_0 = arith.constant 0 : i32
    %c0_i32_1 = arith.constant 0 : i32
    return %c0_i32, %c0_i32_0 : i32, i32
  }
  func.func @transform_5(%arg0: i32) -> (i32, i32) {
    %c0_i32 = arith.constant 0 : i32
    %c0_i32_0 = arith.constant 0 : i32
    return %arg0, %c0_i32 : i32, i32
  }
}

</mosaic_0001>

<bundles_post_ra>
// kernel: simple_model_forward.5
= control target key start
LH: loop header
LB: loop body
LE: loop exit
PB: predicated region body
PF: predicated region fallthrough
CT: control target
= control target key end

     0   :  { %s381_s1 = inlined_call_operand.vmem [shape: bf16[128,128], index: 1, kind: input, shape index: {}]   ;;  %s382_s3 = inlined_call_operand.vmem [shape: bf16[128,128], index: 3, kind: input, shape index: {}]   ;;  %s383_s2 = inlined_call_operand.vmem [shape: f32[1,128], index: 2, kind: input, shape index: {}]   ;;  %s384_s0 = inlined_call_operand.vmem [shape: bf16[16,128], index: 0, kind: input, shape index: {}]   ;;  %s385_s4 = inlined_call_operand.vmem [shape: f32[1,128], index: 4, kind: input, shape index: {}]   ;;  %s386_s5 = inlined_call_operand.vmem [shape: f32[16,128], index: 5, kind: output, shape index: {}]  }
   0x1   :  { %v277_v0 = vld [vmem:[%s381_s1 + $0x38] sm:$0xff]  ;;  %v276_v1 = vld [vmem:[%s381_s1 + $0x30] sm:$0xff]  ;;  %v275_v4 = vld [vmem:[%s381_s1 + $0x28] sm:$0xff] }
   0x2   :  { %96 = vmatpush.bf16.msra.mxu0 %v277_v0  ;;  %v285_v2 = vld [vmem:[%s382_s3 + $0x38] sm:$0xff]  ;;  %v284_v3 = vld [vmem:[%s382_s3 + $0x30] sm:$0xff]  ;;  %v283_v5 = vld [vmem:[%s382_s3 + $0x28] sm:$0xff] }
   0x3   :  { %181 = vmatpush.bf16.msra.mxu1 %v285_v2  ;;  %v274_v6 = vld [vmem:[%s381_s1 + $0x20] sm:$0xff]  ;;  %v273_v8 = vld [vmem:[%s381_s1 + $0x18] sm:$0xff]  ;;  %v272_v9 = vld [vmem:[%s381_s1 + $0x10] sm:$0xff] }
   0x4   :  { %v282_v7 = vld [vmem:[%s382_s3 + $0x20] sm:$0xff]  ;;  %v271_v10 = vld [vmem:[%s381_s1 + $0x8] sm:$0xff]  ;;  %v281_v13 = vld [vmem:[%s382_s3 + $0x18] sm:$0xff] }
   0x5   :  { %v270_v11 = vld [vmem:[%s381_s1] sm:$0xff]  ;;  %v280_v14 = vld [vmem:[%s382_s3 + $0x10] sm:$0xff]  ;;  %v279_v15 = vld [vmem:[%s382_s3 + $0x8] sm:$0xff] }
   0x6   :  { %97 = vmatpush.bf16.msra.mxu0 %v276_v1  ;;  %v269_v12 = vld [vmem:[%s384_s0] sm:$0xff] }
   0x7   :  { %182 = vmatpush.bf16.msra.mxu1 %v284_v3  ;;  %v278_v16 = vld [vmem:[%s382_s3] sm:$0xff] }
   0x8   :  { %v286_v18 = vld [vmem:[%s383_s2] ss:$0 sm:$0xff] }
   0x9   :  { %v287_v25 = vld [vmem:[%s385_s4] ss:$0 sm:$0xff] }
   0xa   :  { %98 = vmatpush.bf16.msra.mxu0 %v275_v4 }
   0xb   :  { %183 = vmatpush.bf16.msra.mxu1 %v283_v5 }
   0xe   :  { %99 = vmatpush.bf16.msra.mxu0 %v274_v6 }
   0xf   :  { %184 = vmatpush.bf16.msra.mxu1 %v282_v7 }
  0x12   :  { %100 = vmatpush.bf16.msra.mxu0 %v273_v8 }
  0x13   :  { %185 = vmatpush.bf16.msra.mxu1 %v281_v13 }
  0x16   :  { %101 = vmatpush.bf16.msra.mxu0 %v272_v9 }
  0x17   :  { %186 = vmatpush.bf16.msra.mxu1 %v280_v14 }
  0x1a   :  { %102 = vmatpush.bf16.msra.mxu0 %v271_v10 }
  0x1b   :  { %187 = vmatpush.bf16.msra.mxu1 %v279_v15 }
  0x1e   :  { %103 = vmatpush.bf16.msra.mxu0 %v270_v11 }
  0x1f   :  { %188 = vmatpush.bf16.msra.mxu1 %v278_v16 }
  0x21   :  { %104 = vmatmul.bf16.vlgmr.msra.gmra.mxu0 %v269_v12 }
  0x9e   :  { %v105_v17 = vpop.f32.mrf.mxu0 }
  0x9f   :  { %v106_v19 = vadd.f32 %v286_v18, %v105_v17 }
  0xa1   :  { %v110_v22 = vmax.f32 %v106_v19, 0.0 }
  0xa6   :  { %v107_v20 = vpop.f32.mrf.mxu0 }
  0xa7   :  { %v108_v21 = vadd.f32 %v286_v18, %v107_v20 }
  0xa9   :  { %v111_v23 = vmax.f32 %v108_v21, 0.0 }
  0xab   :  { %v112_v24 = vpack.c.bf16 %v111_v23, %v110_v22 }
  0xad   :  { %189 = vmatmul.bf16.vlgmr.msra.gmra.mxu1 %v112_v24 }
 0x12a   :  { %v190_v26 = vpop.f32.mrf.mxu1 }
 0x12b   :  { %v191_v27 = vadd.f32 %v287_v25, %v190_v26 }
 0x12d   :  { %195 = vst [vmem:[%s386_s5] sm:$0xff] %v191_v27 }
 0x132   :  { %v192_v28 = vpop.f32.mrf.mxu1 }
 0x133   :  { %v193_v29 = vadd.f32 %v287_v25, %v192_v28 }
 0x135   :  { %196 = vst [vmem:[%s386_s5 + $0x8] sm:$0xff] %v193_v29 }

// kernel: simple_model_forward.3
= control target key start
LH: loop header
LB: loop body
LE: loop exit
PB: predicated region body
PF: predicated region fallthrough
CT: control target
= control target key end

     0   :  { %s960_s24 = smov 0   ;;  %s1096_s0 = inlined_call_operand.vmem [shape: bf16[4,256], index: 0, kind: input, shape index: {}]   ;;  %s1097_s1 = inlined_call_operand.vmem [shape: bf16[2,48,4], index: 1, kind: input, shape index: {}]   ;;  %s1098_s2 = inlined_call_operand.vmem [shape: f32[48,1], index: 2, kind: input, shape index: {}]   ;;  %s1099_s3 = inlined_call_operand.vmem [shape: bf16[2,32,48], index: 3, kind: input, shape index: {}]   ;;  %s1100_s4 = inlined_call_operand.vmem [shape: f32[32,1], index: 4, kind: input, shape index: {}]   ;;  %s1101_s5 = inlined_call_operand.vmem [shape: bf16[2,16,32], index: 5, kind: input, shape index: {}]   ;;  %s1102_s6 = inlined_call_operand.vmem [shape: f32[16,1], index: 6, kind: input, shape index: {}]   ;;  %s1103_s7 = inlined_call_operand.vmem [shape: bf16[8,16,32], index: 7, kind: output, shape index: {}]  }
   0x1 LB: > { %s966_s25 = sadd.s32 4294967295, %s913_s24   ;;  %p793_p0 = scmp.ge.s32.totalorder %s913_s24, 1  ;;  %s913_s24 = sphi %s960_s24, %s17_s24  }
   0x2   : > { %p236_p1 = scmp.lt.s32.totalorder %s913_s24, 3 }
   0x4   : > { %p237_p2 = pnand %p793_p0, %p236_p1 }
   0x5   : > { %p268_p3 = scmp.lt.s32.totalorder (!%p237_p2), %s966_s25, 1  ;;  %s915_s10 = smov (!%p237_p2), 127  }
   0x6   : > { %240 = sbr.rel (%p237_p2) target bundleno = 985 (0x3d9), region = 48  ;;  %s795_s16 = sshll.u32 (!%p237_p2), %s966_s25, 2 }
   0x7   : > { %p273_p4 = scmp.lt.s32.totalorder (!%p237_p2), %s795_s16, 7  ;;  %s918_s21 = smov (!%p237_p2), 96  }
   0x8   : > { %s919_s22 = smov (!%p237_p2), 32  }
   0xb   : > { %s269_s26 = scalar_select %p268_p3, %s966_s25, 1  ;;  %vm329_vm0 = vcmask 1041408   ;;  %v879_v2 = vld [vmem:[%s1097_s1] sm:$0xff]  ;;  %vm319_vm1 = vcmask 31744   ;;  %v411_v4 = vld [vmem:[%s1098_s2 + $0x28] sm:$0xff]  ;;  %v916_v6 = vmov 0  }
   0xc   : > { %v880_v5 = vld [vmem:[%s1097_s1 + $0x8] sm:$0xff]  ;;  %905 = vset.pattern.permute.xlu1 %v916_v6  ;;  %906 = vset.pattern.permute.xlu2 %v916_v6  ;;  %v408_v7 = vld [vmem:[%s1098_s2 + $0x10] sm:$0xff]  ;;  %v409_v10 = vld [vmem:[%s1098_s2 + $0x18] sm:$0xff]  ;;  %vm300_vm2 = vcmask 1039360   ;;  %vm509_vm3 = vcmask 392192   ;;  %vm639_vm4 = vcmask 261120  }
   0xd   : > { %s794_s27 = sshll.u32 %s269_s26, 1  ;;  %439 = vperm.xlu1 %905, %v411_v4   ;;  %904 = vset.pattern.permute.xlu0 %v916_v6  ;;  %v407_v8 = vld [vmem:[%s1098_s2 + $0x8] sm:$0xff]  ;;  %v881_v9 = vld [vmem:[%s1097_s1 + $0x10] sm:$0xff]  ;;  %v882_v14 = vld [vmem:[%s1097_s1 + $0x18] sm:$0xff]  ;;  %s1105_s16 = smov (!%p273_p4, %s795_s16), 7  ;;  %vm699_vm5 = vcmask 257024  }
   0xe   : > { %s271_s30 = scalar_lea.vmem %s1096_s0, %s794_s27  ;;  %429 = vperm.xlu2 %906, %v409_v10   ;;  %v406_v15 = vld [vmem:[%s1098_s2] sm:$0xff]  ;;  %v884_v18 = vld [vmem:[%s1097_s1 + $0x28] sm:$0xff]  ;;  %s878_s17 = sshll.u32 %s1105_s16, 3 }
   0xf   : > { %v280_v0 = vld [vmem:[%s271_s30] sm:$0x3]  ;;  %s1075_s20 = scalar_lea.vmem %s1103_s7, %s878_s17  ;;  %s917_s25 = smov 64  }
  0x10   : > { %295 = vst [vmem:[#allocation1] ss:$4 sm:$0xff] %v280_v0  ;;  %v380_v1 = vsel %vm329_vm0, %v280_v0, 0  ;;  %v410_v16 = vld [vmem:[%s1098_s2 + $0x20] sm:$0xff]  ;;  %v576_v0 = vld [vmem:[%s1100_s4 + $0x18] sm:$0xff] }
  0x11   : > { %389 = vmatpush.bf16.msra.mxu1 %v380_v1  ;;  %v883_v17 = vld [vmem:[%s1097_s1 + $0x20] sm:$0xff] }
  0x12   : > { %v573_v47 = vld [vmem:[%s1100_s4] sm:$0xff] }
  0x13   : > { %v681_v10 = vld [vmem:[%s1102_s6] sm:$0xff] }
  0x14   : > { %831 = vmatmul.msk.bf16.vlgmr.msra.gmra.mxu1 %vm319_vm1, %v879_v2 }
  0x15   : > { %424 = vperm.xlu1 %905, %v408_v7  }
  0x16   : > { %414 = vperm.xlu2 %906, %v406_v15  }
  0x17   : > { %v296_v3 = vld.sshfl [vmem:[#allocation1] sm:$0xff pattern:$0x73625140] }
  0x18   : > { %298 = vrot.lane.b32.xlu0 %v296_v3, %s915_s10 }
  0x1d   : > { %419 = vperm.xlu1 %905, %v407_v8   ;;  %v575_v8 = vld [vmem:[%s1100_s4 + $0x10] sm:$0xff] }
  0x20   : > { %434 = vperm.xlu0 %904, %v410_v16  }
  0x24   : > { %832 = vmatmul.msk.bf16.gmra.mxu1 %vm319_vm1, %v880_v5 }
  0x34   : > { %833 = vmatmul.msk.bf16.gmra.mxu1 %vm319_vm1, %v881_v9  ;;  %v574_v9 = vld [vmem:[%s1100_s4 + $0x8] sm:$0xff] }
  0x68   : > { %v430_v21 = vpop.permute.xlu2 %429 }
  0x70   : > { %v415_v26 = vpop.permute.xlu2 %414 }
  0x7f   : > { %v440_v19 = vpop.permute.xlu1 %439 }
  0x87   : > { %v425_v22 = vpop.permute.xlu1 %424 }
  0x8a   : > { %v299_v11 = vpop.permute.xlu0 %298 }
  0x8b   : > { %v303_v12 = vsel %vm300_vm2, %v299_v11, 0  ;;  %v885_v11 = vld [vmem:[%s1099_s3] sm:$0xff] }
  0x8c   : > { %v330_v13 = vsel %vm329_vm0, %v303_v12, 0  ;;  %v886_v12 = vld [vmem:[%s1099_s3 + $0x8] sm:$0xff] }
  0x8d   : > { %339 = vmatpush.bf16.msra.mxu0 %v330_v13 }
  0x8f   : > { %v420_v29 = vpop.permute.xlu1 %419 }
  0x90   : > { %816 = vmatmul.msk.bf16.vlgmr.msra.gmra.mxu0 %vm319_vm1, %v882_v14 }
  0x91   : > { %v391_v20 = vpop.f32.mrf.mxu1 }
  0x92   : > { %v435_v57 = vpop.permute.xlu0 %434 }
  0x99   : > { %v393_v25 = vpop.f32.mrf.mxu1 }
  0xa0   : > { %817 = vmatmul.msk.bf16.gmra.mxu0 %vm319_vm1, %v883_v17 }
  0xa1   : > { %v396_v33 = vpop.f32.mrf.mxu1 }
  0xa9   : > { %v398_v43 = vpop.f32.mrf.mxu1 }
  0xb0   : > { %818 = vmatmul.msk.bf16.gmra.mxu0 %vm319_vm1, %v884_v18 }
  0xb1   : > { %v401_v51 = vpop.f32.mrf.mxu1 }
  0xb9   : > { %v403_v60 = vpop.f32.mrf.mxu1 }
 0x10d   : > { %v341_v23 = vpop.f32.mrf.mxu0 }
 0x10e   : > { %v392_v24 = vadd.f32 %v391_v20, %v341_v23  ;;  %v888_v20 = vld [vmem:[%s1099_s3 + $0x18] sm:$0xff] }
 0x110   : > { %v442_v27 = vadd.f32 %v415_v26, %v392_v24 }
 0x112   : > { %v448_v30 = vmax.f32 %v442_v27, 0.0 }
 0x114   : > { %v454_v34 = vpack.c.bf16 %v448_v30, %v448_v30 }
 0x115   : > { %v343_v28 = vpop.f32.mrf.mxu0 }
 0x116   : > { %v394_v31 = vadd.f32 %v393_v25, %v343_v28  ;;  %v475_v38 = vunpack.c.l.b16 %v454_v34 }
 0x118   : > { %v443_v32 = vadd.f32 %v420_v29, %v394_v31 }
 0x11a   : > { %v449_v35 = vmax.f32 %v443_v32, 0.0 }
 0x11c   : > { %v455_v36 = vpack.c.bf16 %v449_v35, %v449_v35 }
 0x11d   : > { %v346_v37 = vpop.f32.mrf.mxu0 }
 0x11e   : > { %v476_v39 = vunpack.c.l.b16 %v455_v36  ;;  %v397_v40 = vadd.f32 %v396_v33, %v346_v37 }
 0x120   : > { %v481_v41 = vpack.c.b16 %v476_v39, %v475_v38  ;;  %v444_v42 = vadd.f32 %v425_v22, %v397_v40 }
 0x122   : > { %484 = vrot.lane.b32.xlu1 %v481_v41, %s915_s10  ;;  %v450_v45 = vmax.f32 %v444_v42, 0.0 }
 0x124   : > { %v456_v49 = vpack.c.bf16 %v450_v45, %v450_v45 }
 0x125   : > { %v348_v44 = vpop.f32.mrf.mxu0 }
 0x126   : > { %v399_v46 = vadd.f32 %v398_v43, %v348_v44  ;;  %v477_v54 = vunpack.c.l.b16 %v456_v49 }
 0x128   : > { %v445_v48 = vadd.f32 %v430_v21, %v399_v46 }
 0x12a   : > { %v451_v50 = vmax.f32 %v445_v48, 0.0  ;;  %579 = vperm.xlu1 %905, %v573_v47  }
 0x12c   : > { %v457_v52 = vpack.c.bf16 %v451_v50, %v451_v50 }
 0x12d   : > { %v351_v53 = vpop.f32.mrf.mxu0 }
 0x12e   : > { %v478_v55 = vunpack.c.l.b16 %v457_v52  ;;  %v402_v56 = vadd.f32 %v401_v51, %v351_v53 }
 0x130   : > { %v482_v58 = vpack.c.b16 %v478_v55, %v477_v54  ;;  %v446_v59 = vadd.f32 %v435_v57, %v402_v56  ;;  %v682_v55 = vld [vmem:[%s1102_s6 + $0x8] sm:$0xff]  ;;  %v889_v56 = vld [vmem:[%s1101_s5] sm:$0xff] }
 0x132   : > { %486 = vrot.lane.b32.xlu0 %v482_v58, %s915_s10  ;;  %v452_v62 = vmax.f32 %v446_v59, 0.0 }
 0x134   : > { %v458_v2 = vpack.c.bf16 %v452_v62, %v452_v62 }
 0x135   : > { %v353_v61 = vpop.f32.mrf.mxu0 }
 0x136   : > { %v404_v63 = vadd.f32 %v403_v60, %v353_v61  ;;  %v479_v5 = vunpack.c.l.b16 %v458_v2  ;;  %v890_v61 = vld [vmem:[%s1101_s5 + $0x8] sm:$0xff] }
 0x138   : > { %v447_v1 = vadd.f32 %v440_v19, %v404_v63  ;;  %v887_v19 = vld [vmem:[%s1099_s3 + $0x10] sm:$0xff] }
 0x13a   : > { %v453_v3 = vmax.f32 %v447_v1, 0.0  ;;  %594 = vperm.xlu0 %904, %v576_v0  }
 0x13c   : > { %v459_v4 = vpack.c.bf16 %v453_v3, %v453_v3 }
 0x13e   : > { %v480_v6 = vunpack.c.l.b16 %v459_v4 }
 0x140   : > { %v483_v7 = vpack.c.b16 %v480_v6, %v479_v5 }
 0x142   : > { %488 = vrot.lane.b32.xlu2 %v483_v7, %s915_s10  ;;  %559 = vmatpush.bf16.msra.mxu3 %v483_v7 }
 0x146   : > { %560 = vmatpush.bf16.msra.mxu3 %v482_v58 }
 0x14a   : > { %589 = vperm.xlu2 %906, %v575_v8   ;;  %561 = vmatpush.bf16.msra.mxu3 %v481_v41 }
 0x14d   : > { %856 = vmatmul.msk.bf16.vlgmr.msra.gmra.mxu3 %vm509_vm3, %v885_v11 }
 0x152   : > { %584 = vperm.xlu2 %906, %v574_v9  }
 0x15a   : > { %685 = vperm.xlu2 %906, %v681_v10  }
 0x15d   : > { %857 = vmatmul.msk.bf16.gmra.mxu3 %vm509_vm3, %v886_v12 }
 0x194   : > { %v485_v17 = vpop.permute.xlu1 %484 }
 0x195   : > { %v491_v18 = vsel %vm300_vm2, %v485_v17, 0 }
 0x19c   : > { %v489_v13 = vpop.permute.xlu2 %488  ;;  %v580_v25 = vpop.permute.xlu1 %579 }
 0x19d   : > { %v497_v14 = vsel %vm300_vm2, %v489_v13, 0 }
 0x19e   : > { %521 = vmatpush.bf16.msra.mxu2 %v497_v14 }
 0x1a4   : > { %v487_v15 = vpop.permute.xlu0 %486  ;;  %v590_v22 = vpop.permute.xlu2 %589 }
 0x1a5   : > { %v494_v16 = vsel %vm300_vm2, %v487_v15, 0 }
 0x1a6   : > { %522 = vmatpush.bf16.msra.mxu2 %v494_v16 }
 0x1aa   : > { %523 = vmatpush.bf16.msra.mxu2 %v491_v18 }
 0x1ac   : > { %v585_v31 = vpop.permute.xlu2 %584  ;;  %v595_v47 = vpop.permute.xlu0 %594 }
 0x1ad   : > { %846 = vmatmul.msk.bf16.vlgmr.msra.gmra.mxu2 %vm509_vm3, %v887_v19 }
 0x1b4   : > { %v686_v1 = vpop.permute.xlu2 %685 }
 0x1bd   : > { %847 = vmatmul.msk.bf16.gmra.mxu2 %vm509_vm3, %v888_v20 }
 0x1d0   : > { %v563_v21 = vpop.f32.mrf.mxu3 }
 0x1d8   : > { %v565_v26 = vpop.f32.mrf.mxu3 }
 0x1e0   : > { %v568_v35 = vpop.f32.mrf.mxu3 }
 0x1e8   : > { %v570_v43 = vpop.f32.mrf.mxu3 }
 0x230   : > { %v525_v23 = vpop.f32.mrf.mxu2 }
 0x231   : > { %v564_v24 = vadd.f32 %v563_v21, %v525_v23 }
 0x233   : > { %v597_v27 = vadd.f32 %v580_v25, %v564_v24 }
 0x235   : > { %v601_v29 = vmax.f32 %v597_v27, 0.0 }
 0x237   : > { %v605_v33 = vpack.c.bf16 %v601_v29, %v601_v29 }
 0x238   : > { %v527_v28 = vpop.f32.mrf.mxu2 }
 0x239   : > { %v566_v30 = vadd.f32 %v565_v26, %v527_v28  ;;  %v618_v38 = vunpack.c.l.b16 %v605_v33 }
 0x23b   : > { %v598_v32 = vadd.f32 %v585_v31, %v566_v30 }
 0x23d   : > { %v602_v34 = vmax.f32 %v598_v32, 0.0 }
 0x23f   : > { %v606_v36 = vpack.c.bf16 %v602_v34, %v602_v34 }
 0x240   : > { %v530_v37 = vpop.f32.mrf.mxu2 }
 0x241   : > { %v619_v39 = vunpack.c.l.b16 %v606_v36  ;;  %v569_v40 = vadd.f32 %v568_v35, %v530_v37 }
 0x243   : > { %v622_v41 = vpack.c.b16 %v619_v39, %v618_v38  ;;  %v599_v42 = vadd.f32 %v590_v22, %v569_v40 }
 0x245   : > { %624 = vrot.lane.b32.xlu1 %v622_v41, %s915_s10  ;;  %v603_v45 = vmax.f32 %v599_v42, 0.0 }
 0x247   : > { %v607_v49 = vpack.c.bf16 %v603_v45, %v603_v45 }
 0x248   : > { %v532_v44 = vpop.f32.mrf.mxu2 }
 0x249   : > { %v571_v46 = vadd.f32 %v570_v43, %v532_v44  ;;  %v620_v52 = vunpack.c.l.b16 %v607_v49 }
 0x24b   : > { %v600_v48 = vadd.f32 %v595_v47, %v571_v46 }
 0x24d   : > { %v604_v50 = vmax.f32 %v600_v48, 0.0 }
 0x24f   : > { %v608_v51 = vpack.c.bf16 %v604_v50, %v604_v50 }
 0x251   : > { %v621_v53 = vunpack.c.l.b16 %v608_v51 }
 0x253   : > { %v623_v54 = vpack.c.b16 %v621_v53, %v620_v52 }
 0x255   : > { %626 = vrot.lane.b32.xlu0 %v623_v54, %s915_s10  ;;  %673 = vmatpush.bf16.msrb.mxu3 %v623_v54 }
 0x259   : > { %674 = vmatpush.bf16.msrb.mxu3 %v622_v41 }
 0x25c   : > { %869 = vmatmul.msk.bf16.vlgmr.msrb.gmra.mxu3 %vm639_vm4, %v889_v56 }
 0x25d   : > { %690 = vperm.xlu0 %904, %v682_v55  }
 0x2b7   : > { %v625_v59 = vpop.permute.xlu1 %624 }
 0x2b8   : > { %v629_v60 = vsel %vm300_vm2, %v625_v59, 0 }
 0x2c7   : > { %v627_v57 = vpop.permute.xlu0 %626 }
 0x2c8   : > { %v632_v58 = vsel %vm300_vm2, %v627_v57, 0 }
 0x2c9   : > { %649 = vmatpush.bf16.msrb.mxu2 %v632_v58 }
 0x2cd   : > { %650 = vmatpush.bf16.msrb.mxu2 %v629_v60 }
 0x2cf   : > { %v691_v8 = vpop.permute.xlu0 %690 }
 0x2d0   : > { %864 = vmatmul.msk.bf16.vlgmr.msrb.gmra.mxu2 %vm639_vm4, %v890_v61 }
 0x2df   : > { %v676_v62 = vpop.f32.mrf.mxu3 }
 0x2e7   : > { %v678_v6 = vpop.f32.mrf.mxu3 }
 0x353   : > { %v652_v63 = vpop.f32.mrf.mxu2 }
 0x354   : > { %v677_v0 = vadd.f32 %v676_v62, %v652_v63 }
 0x356   : > { %v693_v2 = vadd.f32 %v686_v1, %v677_v0 }
 0x358   : > { %v695_v3 = vmax.f32 %v693_v2, 0.0 }
 0x35a   : > { %v697_v4 = vpack.c.bf16 %v695_v3, %v695_v3 }
 0x35b   : > { %v654_v5 = vpop.f32.mrf.mxu2 }
 0x35c   : > { %v679_v7 = vadd.f32 %v678_v6, %v654_v5  ;;  %713 = vrot.lane.b32.xlu0 %v697_v4, %s917_s25  ;;  %704 = vrot.lane.b32.xlu1 %v697_v4, %s918_s21  ;;  %700 = vst.msk [vmem:[%s1075_s20] sm:$0xf] %vm699_vm5, %v697_v4 }
 0x35e   : > { %v694_v9 = vadd.f32 %v691_v8, %v679_v7 }
 0x360   : > { %v696_v10 = vmax.f32 %v694_v9, 0.0 }
 0x362   : > { %v698_v11 = vpack.c.bf16 %v696_v10, %v696_v10 }
 0x364   : > { %706 = vrot.lane.b32.xlu2 %v698_v11, %s918_s21  ;;  %724 = vrot.lane.b32.xlu0 %v698_v11, %s919_s22  ;;  %701 = vst.msk [vmem:[%s1075_s20 + $0x4] sm:$0xf] %vm699_vm5, %v698_v11 }
 0x365   : > { %715 = vrot.lane.b32.xlu1 %v698_v11, %s917_s25 }
 0x36c   : > { %722 = vrot.lane.b32.xlu2 %v697_v4, %s919_s22 }
 0x3be   : > { %v707_v12 = vpop.permute.xlu2 %706 }
 0x3bf   : > { %871 = vst.msk [vmem:[%s1075_s20 + $0xc] sm:$0xf] %vm699_vm5, %v707_v12 }
 0x3c6   : > { %v723_v15 = vpop.permute.xlu2 %722 }
 0x3c7   : > { %874 = vst.msk [vmem:[%s1075_s20 + $0x18] sm:$0xf] %vm699_vm5, %v723_v15 }
 0x3ce   : > { %v714_v13 = vpop.permute.xlu0 %713  ;;  %v705_v14 = vpop.permute.xlu1 %704 }
 0x3cf   : > { %870 = vst.msk [vmem:[%s1075_s20 + $0x8] sm:$0xf] %vm699_vm5, %v705_v14 }
 0x3d0   : > { %872 = vst.msk [vmem:[%s1075_s20 + $0x10] sm:$0xf] %vm699_vm5, %v714_v13 }
 0x3d6   : > { %v725_v16 = vpop.permute.xlu0 %724 }
 0x3d7   : > { %v716_v17 = vpop.permute.xlu1 %715  ;;  %875 = vst.msk [vmem:[%s1075_s20 + $0x1c] sm:$0xf] %vm699_vm5, %v725_v16 }
 0x3d8   : > { %873 = vst.msk [vmem:[%s1075_s20 + $0x14] sm:$0xf] %vm699_vm5, %v716_v17 }
 0x3d9 PF: > { %s17_s24 = sadd.s32 1, %s913_s24  }
 0x3da   : > { %p14_p5 = scmp.ge.s32.totalorder %s17_s24, 4  }
 0x3dc   :  { %16 = sbr.rel (!%p14_p5) target bundleno = 1 (0x1), region = 84 }

// kernel: simple_model_forward.4
= control target key start
LH: loop header
LB: loop body
LE: loop exit
PB: predicated region body
PF: predicated region fallthrough
CT: control target
= control target key end

     0   :  { %s722_s1 = inlined_call_operand.vmem [shape: bf16[512,128], index: 1, kind: input, shape index: {}]   ;;  %s723_s0 = inlined_call_operand.vmem [shape: bf16[16,512], index: 0, kind: input, shape index: {}]   ;;  %s724_s2 = inlined_call_operand.vmem [shape: f32[1,128], index: 2, kind: input, shape index: {}]   ;;  %s725_s3 = inlined_call_operand.vmem [shape: bf16[16,128], index: 3, kind: output, shape index: {}]  }
   0x1   :  { %v545_v0 = vld [vmem:[%s722_s1 + $0x38] sm:$0xff]  ;;  %v544_v4 = vld [vmem:[%s722_s1 + $0x30] sm:$0xff]  ;;  %v543_v8 = vld [vmem:[%s722_s1 + $0x28] sm:$0xff] }
   0x2   :  { %v553_v1 = vld [vmem:[%s722_s1 + $0x78] sm:$0xff]  ;;  %307 = vmatpush.bf16.msra.mxu0 %v545_v0  ;;  %v552_v5 = vld [vmem:[%s722_s1 + $0x70] sm:$0xff]  ;;  %v551_v9 = vld [vmem:[%s722_s1 + $0x68] sm:$0xff] }
   0x3   :  { %v561_v2 = vld [vmem:[%s722_s1 + $0xb8] sm:$0xff]  ;;  %321 = vmatpush.bf16.msra.mxu1 %v553_v1  ;;  %v560_v6 = vld [vmem:[%s722_s1 + $0xb0] sm:$0xff]  ;;  %v559_v10 = vld [vmem:[%s722_s1 + $0xa8] sm:$0xff] }
   0x4   :  { %v569_v3 = vld [vmem:[%s722_s1 + $0xf8] sm:$0xff]  ;;  %335 = vmatpush.bf16.msra.mxu2 %v561_v2  ;;  %v568_v7 = vld [vmem:[%s722_s1 + $0xf0] sm:$0xff]  ;;  %v567_v11 = vld [vmem:[%s722_s1 + $0xe8] sm:$0xff] }
   0x5   :  { %349 = vmatpush.bf16.msra.mxu3 %v569_v3  ;;  %v542_v12 = vld [vmem:[%s722_s1 + $0x20] sm:$0xff]  ;;  %v541_v16 = vld [vmem:[%s722_s1 + $0x18] sm:$0xff]  ;;  %v540_v20 = vld [vmem:[%s722_s1 + $0x10] sm:$0xff] }
   0x6   :  { %308 = vmatpush.bf16.msra.mxu0 %v544_v4  ;;  %v550_v13 = vld [vmem:[%s722_s1 + $0x60] sm:$0xff]  ;;  %v549_v17 = vld [vmem:[%s722_s1 + $0x58] sm:$0xff]  ;;  %v548_v21 = vld [vmem:[%s722_s1 + $0x50] sm:$0xff] }
   0x7   :  { %322 = vmatpush.bf16.msra.mxu1 %v552_v5  ;;  %v558_v14 = vld [vmem:[%s722_s1 + $0xa0] sm:$0xff]  ;;  %v557_v18 = vld [vmem:[%s722_s1 + $0x98] sm:$0xff]  ;;  %v556_v22 = vld [vmem:[%s722_s1 + $0x90] sm:$0xff] }
   0x8   :  { %336 = vmatpush.bf16.msra.mxu2 %v560_v6  ;;  %v566_v15 = vld [vmem:[%s722_s1 + $0xe0] sm:$0xff]  ;;  %v565_v19 = vld [vmem:[%s722_s1 + $0xd8] sm:$0xff]  ;;  %v564_v23 = vld [vmem:[%s722_s1 + $0xd0] sm:$0xff] }
   0x9   :  { %350 = vmatpush.bf16.msra.mxu3 %v568_v7  ;;  %v539_v24 = vld [vmem:[%s722_s1 + $0x8] sm:$0xff]  ;;  %v538_v28 = vld [vmem:[%s722_s1] sm:$0xff]  ;;  %v536_v33 = vld [vmem:[%s723_s0 + $0xc] sm:$0xf0] }
   0xa   :  { %309 = vmatpush.bf16.msra.mxu0 %v543_v8  ;;  %v547_v25 = vld [vmem:[%s722_s1 + $0x48] sm:$0xff]  ;;  %v546_v29 = vld [vmem:[%s722_s1 + $0x40] sm:$0xff]  ;;  %v394_v35 = vld [vmem:[%s723_s0 + $0x10] sm:$0xf0] }
   0xb   :  { %323 = vmatpush.bf16.msra.mxu1 %v551_v9  ;;  %v555_v26 = vld [vmem:[%s722_s1 + $0x88] sm:$0xff]  ;;  %v554_v30 = vld [vmem:[%s722_s1 + $0x80] sm:$0xff]  ;;  %v537_v37 = vld [vmem:[%s723_s0 + $0x14] sm:$0xf0] }
   0xc   :  { %337 = vmatpush.bf16.msra.mxu2 %v559_v10  ;;  %v563_v27 = vld [vmem:[%s722_s1 + $0xc8] sm:$0xff]  ;;  %v562_v31 = vld [vmem:[%s722_s1 + $0xc0] sm:$0xff]  ;;  %v402_v39 = vld [vmem:[%s723_s0 + $0x18] sm:$0xf0] }
   0xd   :  { %351 = vmatpush.bf16.msra.mxu3 %v567_v11  ;;  %v392_v32 = vld [vmem:[%s723_s0] sm:$0xf]  ;;  %v534_v34 = vld [vmem:[%s723_s0 + $0x4] sm:$0xf]  ;;  %v400_v36 = vld [vmem:[%s723_s0 + $0x8] sm:$0xf] }
   0xe   :  { %310 = vmatpush.bf16.msra.mxu0 %v542_v12  ;;  %v535_v38 = vld [vmem:[%s723_s0 + $0xc] sm:$0xf]  ;;  %v393_v40 = vor.u32 %v536_v33, %v392_v32  ;;  %v397_v41 = vor.u32 %v534_v34, %v394_v35  ;;  %v401_v42 = vor.u32 %v537_v37, %v400_v36  ;;  %v575_v53 = vld [vmem:[%s724_s2] ss:$0 sm:$0xff] }
   0xf   :  { %324 = vmatpush.bf16.msra.mxu1 %v550_v13  ;;  %v405_v43 = vor.u32 %v535_v38, %v402_v39 }
  0x10   :  { %338 = vmatpush.bf16.msra.mxu2 %v558_v14 }
  0x11   :  { %352 = vmatpush.bf16.msra.mxu3 %v566_v15 }
  0x12   :  { %311 = vmatpush.bf16.msra.mxu0 %v541_v16 }
  0x13   :  { %325 = vmatpush.bf16.msra.mxu1 %v549_v17 }
  0x14   :  { %339 = vmatpush.bf16.msra.mxu2 %v557_v18 }
  0x15   :  { %353 = vmatpush.bf16.msra.mxu3 %v565_v19 }
  0x16   :  { %312 = vmatpush.bf16.msra.mxu0 %v540_v20 }
  0x17   :  { %326 = vmatpush.bf16.msra.mxu1 %v548_v21 }
  0x18   :  { %340 = vmatpush.bf16.msra.mxu2 %v556_v22 }
  0x19   :  { %354 = vmatpush.bf16.msra.mxu3 %v564_v23 }
  0x1a   :  { %313 = vmatpush.bf16.msra.mxu0 %v539_v24 }
  0x1b   :  { %327 = vmatpush.bf16.msra.mxu1 %v547_v25 }
  0x1c   :  { %341 = vmatpush.bf16.msra.mxu2 %v555_v26 }
  0x1d   :  { %355 = vmatpush.bf16.msra.mxu3 %v563_v27 }
  0x1e   :  { %314 = vmatpush.bf16.msra.mxu0 %v538_v28 }
  0x1f   :  { %328 = vmatpush.bf16.msra.mxu1 %v546_v29 }
  0x20   :  { %342 = vmatpush.bf16.msra.mxu2 %v554_v30 }
  0x21   :  { %356 = vmatpush.bf16.msra.mxu3 %v562_v31  ;;  %315 = vmatmul.bf16.vlgmr.msra.gmra.mxu0 %v393_v40 }
  0x22   :  { %329 = vmatmul.bf16.vlgmr.msra.gmra.mxu1 %v397_v41 }
  0x23   :  { %343 = vmatmul.bf16.vlgmr.msra.gmra.mxu2 %v401_v42 }
  0x24   :  { %357 = vmatmul.bf16.vlgmr.msra.gmra.mxu3 %v405_v43 }
  0x9e   :  { %v316_v44 = vpop.f32.mrf.mxu0 }
  0x9f   :  { %v330_v45 = vpop.f32.mrf.mxu1 }
  0xa0   :  { %v331_v46 = vadd.f32 %v330_v45, %v316_v44 }
  0xa6   :  { %v344_v47 = vpop.f32.mrf.mxu2  ;;  %v318_v50 = vpop.f32.mrf.mxu0 }
  0xa7   :  { %v358_v48 = vpop.f32.mrf.mxu3  ;;  %v345_v49 = vadd.f32 %v344_v47, %v331_v46  ;;  %v332_v51 = vpop.f32.mrf.mxu1 }
  0xa8   :  { %v333_v54 = vadd.f32 %v332_v51, %v318_v50 }
  0xa9   :  { %v359_v52 = vadd.f32 %v358_v48, %v345_v49 }
  0xab   :  { %v376_v58 = vadd.f32 %v575_v53, %v359_v52 }
  0xad   :  { %v378_v61 = vmax.f32 %v376_v58, 0.0 }
  0xae   :  { %v346_v55 = vpop.f32.mrf.mxu2 }
  0xaf   :  { %v347_v56 = vadd.f32 %v346_v55, %v333_v54  ;;  %v360_v57 = vpop.f32.mrf.mxu3 }
  0xb1   :  { %v361_v59 = vadd.f32 %v360_v57, %v347_v56 }
  0xb3   :  { %v377_v60 = vadd.f32 %v575_v53, %v361_v59 }
  0xb5   :  { %v379_v62 = vmax.f32 %v377_v60, 0.0 }
  0xb7   :  { %v573_v63 = vpack.c.bf16 %v379_v62, %v378_v61 }
  0xb9   :  { %574 = vst [vmem:[%s725_s3] sm:$0xff] %v573_v63  }

</bundles_post_ra>
